<compile_context>
chip_gen: v7x
topology: tpu7x:2x2x1
jax: 0.10.0
libtpu: 0.0.40
codegen_flags: <defaults>
</compile_context>

<pallas_src>
import functools

import numpy as np
import jax
import jax.numpy as jnp
from jax import lax
from jax.experimental import pallas as pl
from jax.experimental.pallas import tpu as pltpu


def _spatial_masks(H, W, HWp):
    """(9, HWp) f32 validity masks for the 3x3 spatial taps (zero padding)."""
    m = np.zeros((9, HWp), np.float32)
    h = np.arange(H)
    w = np.arange(W)
    for kh in range(3):
        for kw in range(3):
            oh, ow = kh - 1, kw - 1
            mh = ((h + oh >= 0) & (h + oh < H)).astype(np.float32)
            mw = ((w + ow >= 0) & (w + ow < W)).astype(np.float32)
            m[kh * 3 + kw, : H * W] = (mh[:, None] * mw[None, :]).reshape(-1)
    return m


def _csam_kernel(scal_ref, wm_ref, x_ref, o_ref, *, W, cdt):
    # scal_ref: (5,)  SMEM f32: [w_centre(kd=0), w_centre(1), w_centre(2), bias, gamma]
    # wm_ref  : (27,1,HWp) VMEM: conv weight (kd,kh,kw) pre-multiplied by the
    #           zero-padding validity mask of its spatial tap (zero in lane pad).
    # x_ref   : (bt, C, HWp) lane-dense input block; o_ref: same-shape output.
    bt, C, HWp = x_ref.shape
    x = x_ref[...].astype(cdt)

    # Centre tap (kh=kw=1): always in range -> scalar FMAs, no roll, no mask.
    s0 = scal_ref[0].astype(cdt) * x
    s1 = scal_ref[1].astype(cdt) * x
    s2 = scal_ref[2].astype(cdt) * x

    # 8 off-centre spatial taps: one static XLU lane rotation each, reused for
    # all 3 channel offsets; boundary masks are already folded into wm.
    for kh in range(3):
        for kw in range(3):
            if kh == 1 and kw == 1:
                continue
            d = (kh - 1) * W + (kw - 1)                 # flat spatial offset
            rolled = pltpu.roll(x, shift=(-d) % HWp, axis=2)   # rolled[i] = x[i+d]
            tap = kh * 3 + kw
            s0 = s0 + rolled * wm_ref[tap]
            s1 = s1 + rolled * wm_ref[9 + tap]
            s2 = s2 + rolled * wm_ref[18 + tap]

    # Channel combine (zero padding along C): conv[c] = bias + s1[c] + s0[c-1] + s2[c+1]
    conv = s1 + scal_ref[3].astype(cdt)
    if C > 1:
        z = jnp.zeros((bt, 1, HWp), cdt)
        conv = conv + jnp.concatenate([z, s0[:, : C - 1]], axis=1)
        conv = conv + jnp.concatenate([s2[:, 1:], z], axis=1)

    att = scal_ref[4].astype(cdt) * jax.nn.sigmoid(conv)   # gamma * sigmoid(conv3d(x))
    o_ref[...] = (x * att + x).astype(o_ref.dtype)


@jax.jit
def csam_forward(x, conv_w, conv_b, gamma):
    """x: (B, C, H, W); conv_w: (1,1,3,3,3); conv_b: (1,); gamma: (1,)."""
    B, C, H, W = x.shape
    HW = H * W
    HWp = max(128, ((HW + 127) // 128) * 128)        # lane-dense trailing dim

    # bf16 inputs compute in packed bf16 (2x VPU throughput on v6e/v7x).
    # TODO(synk): force float32 here when targeting v5e (no bf16 VPU/EUP).
    cdt = jnp.bfloat16 if x.dtype == jnp.bfloat16 else jnp.float32

    x2 = x.reshape(B, C, HW)
    if HWp != HW:
        x2 = jnp.pad(x2, ((0, 0), (0, 0), (0, HWp - HW)))

    w3 = conv_w.reshape(3, 9).astype(jnp.float32)            # (kd, kh*3+kw)
    masks = jnp.asarray(_spatial_masks(H, W, HWp))            # (9, HWp) constant
    wm = (w3[:, :, None] * masks[None]).reshape(27, 1, HWp).astype(cdt)
    scal = jnp.concatenate([w3[:, 4],                         # centre-tap weights
                            conv_b.reshape(1).astype(jnp.float32),
                            gamma.reshape(1).astype(jnp.float32)])

    # Biggest batch fold whose input block stays ~<=2 MiB, while keeping >= 2
    # grid steps (pipelining + both v7x TensorCores on the "parallel" axis).
    block_budget = 2 * 1024 * 1024
    per_batch = C * HWp * x.dtype.itemsize
    min_steps = 2 if B >= 2 else 1
    cands = [d for d in range(1, B + 1)
             if B % d == 0 and d * per_batch <= block_budget
             and (B // d) >= min_steps]
    bt = max(cands) if cands else 1
    # TODO(synk): if a single batch exceeds the budget (huge C*H*W, esp. v7x's
    # 64 MiB VMEM), add an H-tile grid axis with a 1-row halo instead of bt=1.

    blk = bt * C * HWp
    est = (4 * blk * x.dtype.itemsize                    # double-buffered in/out
           + 2 * 27 * HWp * jnp.dtype(cdt).itemsize      # double-buffered wm
           + 8 * blk * jnp.dtype(cdt).itemsize           # live compute temporaries
           + (2 << 20))                                  # headroom
    vmem_limit = int(min(48 * 1024 * 1024, max(est, 16 * 1024 * 1024)))

    out = pl.pallas_call(
        functools.partial(_csam_kernel, W=W, cdt=cdt),
        out_shape=jax.ShapeDtypeStruct((B, C, HWp), x.dtype),
        grid_spec=pltpu.PrefetchScalarGridSpec(
            num_scalar_prefetch=0,
            grid=(B // bt,),
            in_specs=[
                pl.BlockSpec(memory_space=pltpu.MemorySpace.SMEM),   # scal (5,)
                pl.BlockSpec((27, 1, HWp), lambda b: (0, 0, 0)),     # wm (fetched once)
                pl.BlockSpec((bt, C, HWp), lambda b: (b, 0, 0)),     # input block
            ],
            out_specs=pl.BlockSpec((bt, C, HWp), lambda b: (b, 0, 0)),
        ),
        compiler_params=pltpu.CompilerParams(
            dimension_semantics=("parallel",),
            vmem_limit_bytes=vmem_limit,
        ),
    )(scal, wm, x2)

    return out[:, :, :HW].reshape(B, C, H, W)


def csam_reference(x, conv_w, conv_b, gamma):
    """Pure-JAX reference mirroring the PyTorch forward exactly (f32 conv)."""
    B, C, H, W = x.shape
    x5 = x[:, None]                                   # (B, 1, C, H, W)
    out = lax.conv_general_dilated(
        x5, conv_w,
        window_strides=(1, 1, 1),
        padding=((1, 1), (1, 1), (1, 1)),
        dimension_numbers=("NCDHW", "OIDHW", "NCDHW"),
        precision=lax.Precision.HIGHEST)
    out = out + conv_b.reshape(1, 1, 1, 1, 1)
    out = gamma.reshape(()) * jax.nn.sigmoid(out)
    out = out.reshape(B, C, H, W)
    return x * out + x


if __name__ == "__main__":
    key = jax.random.PRNGKey(0)
    kx, kw, kb = jax.random.split(key, 3)

    B, C, H, W = 2, 4, 16, 16
    x = jax.random.normal(kx, (B, C, H, W), dtype=jnp.float32)

    # CSAM_Module params: Conv3d(1,1,3,1,1) weight/bias and scalar gamma
    # (PyTorch inits gamma to 0; use a nonzero value so attention is exercised).
    conv_w = jax.random.normal(kw, (1, 1, 3, 3, 3), dtype=jnp.float32) * 0.2
    conv_b = jax.random.normal(kb, (1,), dtype=jnp.float32) * 0.1
    gamma = jnp.array([0.5], dtype=jnp.float32)

    out = jax.block_until_ready(csam_forward(x, conv_w, conv_b, gamma))
    ref = csam_reference(x, conv_w, conv_b, gamma)

    assert out.shape == x.shape and out.dtype == x.dtype
    assert jnp.allclose(out, ref, atol=1e-4, rtol=1e-4), "mismatch vs reference"
    print("KERNEL_OK")
</pallas_src>

<mosaic_0001>
module attributes {stable_mosaic.version = 11 : i64} {
  func.func @_csam_kernel(%arg0: i32, %arg1: memref<5xf32, #tpu.memory_space<smem>>, %arg2: memref<27x1x256xf32, #tpu.memory_space<vmem>>, %arg3: memref<1x4x256xf32, #tpu.memory_space<vmem>>, %arg4: memref<1x4x256xf32, #tpu.memory_space<vmem>>) attributes {dimension_semantics = [#tpu.dimension_semantics<parallel>], iteration_bounds = array<i64: 2>, scalar_prefetch = 0 : i64, scratch_operands = 0 : i64, tpu.core_type = #tpu.core_type<tc>, window_params = [{transform_indices = @transform_0, window_bounds = array<i64: 5>}, {pipeline_mode = #tpu.pipeline_mode<synchronous>, transform_indices = @transform_1, window_bounds = array<i64: 27, 1, 256>}, {transform_indices = @transform_2, window_bounds = array<i64: 1, 4, 256>}, {transform_indices = @transform_3, window_bounds = array<i64: 1, 4, 256>}]} {
    %c0 = arith.constant 0 : index
    %c0_0 = arith.constant 0 : index
    %c0_1 = arith.constant 0 : index
    %0 = vector.load %arg3[%c0, %c0_0, %c0_1] : memref<1x4x256xf32, #tpu.memory_space<vmem>>, vector<1x4x256xf32>
    %c0_2 = arith.constant 0 : index
    %1 = memref.load %arg1[%c0_2] : memref<5xf32, #tpu.memory_space<smem>>
    %2 = vector.broadcast %1 : f32 to vector<1x4x256xf32>
    %3 = arith.mulf %2, %0 : vector<1x4x256xf32>
    %c1 = arith.constant 1 : index
    %4 = memref.load %arg1[%c1] : memref<5xf32, #tpu.memory_space<smem>>
    %5 = vector.broadcast %4 : f32 to vector<1x4x256xf32>
    %6 = arith.mulf %5, %0 : vector<1x4x256xf32>
    %c2 = arith.constant 2 : index
    %7 = memref.load %arg1[%c2] : memref<5xf32, #tpu.memory_space<smem>>
    %8 = vector.broadcast %7 : f32 to vector<1x4x256xf32>
    %9 = arith.mulf %8, %0 : vector<1x4x256xf32>
    %c17_i32 = arith.constant 17 : i32
    %10 = tpu.dynamic_rotate %0 by %c17_i32 dim 2 : vector<1x4x256xf32>, i32 -> vector<1x4x256xf32>
    %c0_3 = arith.constant 0 : index
    %c0_4 = arith.constant 0 : index
    %c0_5 = arith.constant 0 : index
    %11 = vector.load %arg2[%c0_3, %c0_4, %c0_5] : memref<27x1x256xf32, #tpu.memory_space<vmem>>, vector<1x1x256xf32>
    %12 = vector.shape_cast %11 : vector<1x1x256xf32> to vector<1x256xf32>
    %13 = vector.shape_cast %12 : vector<1x256xf32> to vector<1x1x256xf32>
    %14 = vector.broadcast %13 : vector<1x1x256xf32> to vector<1x4x256xf32>
    %15 = arith.mulf %10, %14 : vector<1x4x256xf32>
    %16 = arith.addf %3, %15 : vector<1x4x256xf32>
    %c9 = arith.constant 9 : index
    %c0_6 = arith.constant 0 : index
    %c0_7 = arith.constant 0 : index
    %17 = vector.load %arg2[%c9, %c0_6, %c0_7] : memref<27x1x256xf32, #tpu.memory_space<vmem>>, vector<1x1x256xf32>
    %18 = vector.shape_cast %17 : vector<1x1x256xf32> to vector<1x256xf32>
    %19 = vector.shape_cast %18 : vector<1x256xf32> to vector<1x1x256xf32>
    %20 = vector.broadcast %19 : vector<1x1x256xf32> to vector<1x4x256xf32>
    %21 = arith.mulf %10, %20 : vector<1x4x256xf32>
    %22 = arith.addf %6, %21 : vector<1x4x256xf32>
    %c18 = arith.constant 18 : index
    %c0_8 = arith.constant 0 : index
    %c0_9 = arith.constant 0 : index
    %23 = vector.load %arg2[%c18, %c0_8, %c0_9] : memref<27x1x256xf32, #tpu.memory_space<vmem>>, vector<1x1x256xf32>
    %24 = vector.shape_cast %23 : vector<1x1x256xf32> to vector<1x256xf32>
    %25 = vector.shape_cast %24 : vector<1x256xf32> to vector<1x1x256xf32>
    %26 = vector.broadcast %25 : vector<1x1x256xf32> to vector<1x4x256xf32>
    %27 = arith.mulf %10, %26 : vector<1x4x256xf32>
    %28 = arith.addf %9, %27 : vector<1x4x256xf32>
    %c16_i32 = arith.constant 16 : i32
    %29 = tpu.dynamic_rotate %0 by %c16_i32 dim 2 : vector<1x4x256xf32>, i32 -> vector<1x4x256xf32>
    %c1_10 = arith.constant 1 : index
    %c0_11 = arith.constant 0 : index
    %c0_12 = arith.constant 0 : index
    %30 = vector.load %arg2[%c1_10, %c0_11, %c0_12] : memref<27x1x256xf32, #tpu.memory_space<vmem>>, vector<1x1x256xf32>
    %31 = vector.shape_cast %30 : vector<1x1x256xf32> to vector<1x256xf32>
    %32 = vector.shape_cast %31 : vector<1x256xf32> to vector<1x1x256xf32>
    %33 = vector.broadcast %32 : vector<1x1x256xf32> to vector<1x4x256xf32>
    %34 = arith.mulf %29, %33 : vector<1x4x256xf32>
    %35 = arith.addf %16, %34 : vector<1x4x256xf32>
    %c10 = arith.constant 10 : index
    %c0_13 = arith.constant 0 : index
    %c0_14 = arith.constant 0 : index
    %36 = vector.load %arg2[%c10, %c0_13, %c0_14] : memref<27x1x256xf32, #tpu.memory_space<vmem>>, vector<1x1x256xf32>
    %37 = vector.shape_cast %36 : vector<1x1x256xf32> to vector<1x256xf32>
    %38 = vector.shape_cast %37 : vector<1x256xf32> to vector<1x1x256xf32>
    %39 = vector.broadcast %38 : vector<1x1x256xf32> to vector<1x4x256xf32>
    %40 = arith.mulf %29, %39 : vector<1x4x256xf32>
    %41 = arith.addf %22, %40 : vector<1x4x256xf32>
    %c19 = arith.constant 19 : index
    %c0_15 = arith.constant 0 : index
    %c0_16 = arith.constant 0 : index
    %42 = vector.load %arg2[%c19, %c0_15, %c0_16] : memref<27x1x256xf32, #tpu.memory_space<vmem>>, vector<1x1x256xf32>
    %43 = vector.shape_cast %42 : vector<1x1x256xf32> to vector<1x256xf32>
    %44 = vector.shape_cast %43 : vector<1x256xf32> to vector<1x1x256xf32>
    %45 = vector.broadcast %44 : vector<1x1x256xf32> to vector<1x4x256xf32>
    %46 = arith.mulf %29, %45 : vector<1x4x256xf32>
    %47 = arith.addf %28, %46 : vector<1x4x256xf32>
    %c15_i32 = arith.constant 15 : i32
    %48 = tpu.dynamic_rotate %0 by %c15_i32 dim 2 : vector<1x4x256xf32>, i32 -> vector<1x4x256xf32>
    %c2_17 = arith.constant 2 : index
    %c0_18 = arith.constant 0 : index
    %c0_19 = arith.constant 0 : index
    %49 = vector.load %arg2[%c2_17, %c0_18, %c0_19] : memref<27x1x256xf32, #tpu.memory_space<vmem>>, vector<1x1x256xf32>
    %50 = vector.shape_cast %49 : vector<1x1x256xf32> to vector<1x256xf32>
    %51 = vector.shape_cast %50 : vector<1x256xf32> to vector<1x1x256xf32>
    %52 = vector.broadcast %51 : vector<1x1x256xf32> to vector<1x4x256xf32>
    %53 = arith.mulf %48, %52 : vector<1x4x256xf32>
    %54 = arith.addf %35, %53 : vector<1x4x256xf32>
    %c11 = arith.constant 11 : index
    %c0_20 = arith.constant 0 : index
    %c0_21 = arith.constant 0 : index
    %55 = vector.load %arg2[%c11, %c0_20, %c0_21] : memref<27x1x256xf32, #tpu.memory_space<vmem>>, vector<1x1x256xf32>
    %56 = vector.shape_cast %55 : vector<1x1x256xf32> to vector<1x256xf32>
    %57 = vector.shape_cast %56 : vector<1x256xf32> to vector<1x1x256xf32>
    %58 = vector.broadcast %57 : vector<1x1x256xf32> to vector<1x4x256xf32>
    %59 = arith.mulf %48, %58 : vector<1x4x256xf32>
    %60 = arith.addf %41, %59 : vector<1x4x256xf32>
    %c20 = arith.constant 20 : index
    %c0_22 = arith.constant 0 : index
    %c0_23 = arith.constant 0 : index
    %61 = vector.load %arg2[%c20, %c0_22, %c0_23] : memref<27x1x256xf32, #tpu.memory_space<vmem>>, vector<1x1x256xf32>
    %62 = vector.shape_cast %61 : vector<1x1x256xf32> to vector<1x256xf32>
    %63 = vector.shape_cast %62 : vector<1x256xf32> to vector<1x1x256xf32>
    %64 = vector.broadcast %63 : vector<1x1x256xf32> to vector<1x4x256xf32>
    %65 = arith.mulf %48, %64 : vector<1x4x256xf32>
    %66 = arith.addf %47, %65 : vector<1x4x256xf32>
    %c1_i32 = arith.constant 1 : i32
    %67 = tpu.dynamic_rotate %0 by %c1_i32 dim 2 : vector<1x4x256xf32>, i32 -> vector<1x4x256xf32>
    %c3 = arith.constant 3 : index
    %c0_24 = arith.constant 0 : index
    %c0_25 = arith.constant 0 : index
    %68 = vector.load %arg2[%c3, %c0_24, %c0_25] : memref<27x1x256xf32, #tpu.memory_space<vmem>>, vector<1x1x256xf32>
    %69 = vector.shape_cast %68 : vector<1x1x256xf32> to vector<1x256xf32>
    %70 = vector.shape_cast %69 : vector<1x256xf32> to vector<1x1x256xf32>
    %71 = vector.broadcast %70 : vector<1x1x256xf32> to vector<1x4x256xf32>
    %72 = arith.mulf %67, %71 : vector<1x4x256xf32>
    %73 = arith.addf %54, %72 : vector<1x4x256xf32>
    %c12 = arith.constant 12 : index
    %c0_26 = arith.constant 0 : index
    %c0_27 = arith.constant 0 : index
    %74 = vector.load %arg2[%c12, %c0_26, %c0_27] : memref<27x1x256xf32, #tpu.memory_space<vmem>>, vector<1x1x256xf32>
    %75 = vector.shape_cast %74 : vector<1x1x256xf32> to vector<1x256xf32>
    %76 = vector.shape_cast %75 : vector<1x256xf32> to vector<1x1x256xf32>
    %77 = vector.broadcast %76 : vector<1x1x256xf32> to vector<1x4x256xf32>
    %78 = arith.mulf %67, %77 : vector<1x4x256xf32>
    %79 = arith.addf %60, %78 : vector<1x4x256xf32>
    %c21 = arith.constant 21 : index
    %c0_28 = arith.constant 0 : index
    %c0_29 = arith.constant 0 : index
    %80 = vector.load %arg2[%c21, %c0_28, %c0_29] : memref<27x1x256xf32, #tpu.memory_space<vmem>>, vector<1x1x256xf32>
    %81 = vector.shape_cast %80 : vector<1x1x256xf32> to vector<1x256xf32>
    %82 = vector.shape_cast %81 : vector<1x256xf32> to vector<1x1x256xf32>
    %83 = vector.broadcast %82 : vector<1x1x256xf32> to vector<1x4x256xf32>
    %84 = arith.mulf %67, %83 : vector<1x4x256xf32>
    %85 = arith.addf %66, %84 : vector<1x4x256xf32>
    %c255_i32 = arith.constant 255 : i32
    %86 = tpu.dynamic_rotate %0 by %c255_i32 dim 2 : vector<1x4x256xf32>, i32 -> vector<1x4x256xf32>
    %c5 = arith.constant 5 : index
    %c0_30 = arith.constant 0 : index
    %c0_31 = arith.constant 0 : index
    %87 = vector.load %arg2[%c5, %c0_30, %c0_31] : memref<27x1x256xf32, #tpu.memory_space<vmem>>, vector<1x1x256xf32>
    %88 = vector.shape_cast %87 : vector<1x1x256xf32> to vector<1x256xf32>
    %89 = vector.shape_cast %88 : vector<1x256xf32> to vector<1x1x256xf32>
    %90 = vector.broadcast %89 : vector<1x1x256xf32> to vector<1x4x256xf32>
    %91 = arith.mulf %86, %90 : vector<1x4x256xf32>
    %92 = arith.addf %73, %91 : vector<1x4x256xf32>
    %c14 = arith.constant 14 : index
    %c0_32 = arith.constant 0 : index
    %c0_33 = arith.constant 0 : index
    %93 = vector.load %arg2[%c14, %c0_32, %c0_33] : memref<27x1x256xf32, #tpu.memory_space<vmem>>, vector<1x1x256xf32>
    %94 = vector.shape_cast %93 : vector<1x1x256xf32> to vector<1x256xf32>
    %95 = vector.shape_cast %94 : vector<1x256xf32> to vector<1x1x256xf32>
    %96 = vector.broadcast %95 : vector<1x1x256xf32> to vector<1x4x256xf32>
    %97 = arith.mulf %86, %96 : vector<1x4x256xf32>
    %98 = arith.addf %79, %97 : vector<1x4x256xf32>
    %c23 = arith.constant 23 : index
    %c0_34 = arith.constant 0 : index
    %c0_35 = arith.constant 0 : index
    %99 = vector.load %arg2[%c23, %c0_34, %c0_35] : memref<27x1x256xf32, #tpu.memory_space<vmem>>, vector<1x1x256xf32>
    %100 = vector.shape_cast %99 : vector<1x1x256xf32> to vector<1x256xf32>
    %101 = vector.shape_cast %100 : vector<1x256xf32> to vector<1x1x256xf32>
    %102 = vector.broadcast %101 : vector<1x1x256xf32> to vector<1x4x256xf32>
    %103 = arith.mulf %86, %102 : vector<1x4x256xf32>
    %104 = arith.addf %85, %103 : vector<1x4x256xf32>
    %c241_i32 = arith.constant 241 : i32
    %105 = tpu.dynamic_rotate %0 by %c241_i32 dim 2 : vector<1x4x256xf32>, i32 -> vector<1x4x256xf32>
    %c6 = arith.constant 6 : index
    %c0_36 = arith.constant 0 : index
    %c0_37 = arith.constant 0 : index
    %106 = vector.load %arg2[%c6, %c0_36, %c0_37] : memref<27x1x256xf32, #tpu.memory_space<vmem>>, vector<1x1x256xf32>
    %107 = vector.shape_cast %106 : vector<1x1x256xf32> to vector<1x256xf32>
    %108 = vector.shape_cast %107 : vector<1x256xf32> to vector<1x1x256xf32>
    %109 = vector.broadcast %108 : vector<1x1x256xf32> to vector<1x4x256xf32>
    %110 = arith.mulf %105, %109 : vector<1x4x256xf32>
    %111 = arith.addf %92, %110 : vector<1x4x256xf32>
    %c15 = arith.constant 15 : index
    %c0_38 = arith.constant 0 : index
    %c0_39 = arith.constant 0 : index
    %112 = vector.load %arg2[%c15, %c0_38, %c0_39] : memref<27x1x256xf32, #tpu.memory_space<vmem>>, vector<1x1x256xf32>
    %113 = vector.shape_cast %112 : vector<1x1x256xf32> to vector<1x256xf32>
    %114 = vector.shape_cast %113 : vector<1x256xf32> to vector<1x1x256xf32>
    %115 = vector.broadcast %114 : vector<1x1x256xf32> to vector<1x4x256xf32>
    %116 = arith.mulf %105, %115 : vector<1x4x256xf32>
    %117 = arith.addf %98, %116 : vector<1x4x256xf32>
    %c24 = arith.constant 24 : index
    %c0_40 = arith.constant 0 : index
    %c0_41 = arith.constant 0 : index
    %118 = vector.load %arg2[%c24, %c0_40, %c0_41] : memref<27x1x256xf32, #tpu.memory_space<vmem>>, vector<1x1x256xf32>
    %119 = vector.shape_cast %118 : vector<1x1x256xf32> to vector<1x256xf32>
    %120 = vector.shape_cast %119 : vector<1x256xf32> to vector<1x1x256xf32>
    %121 = vector.broadcast %120 : vector<1x1x256xf32> to vector<1x4x256xf32>
    %122 = arith.mulf %105, %121 : vector<1x4x256xf32>
    %123 = arith.addf %104, %122 : vector<1x4x256xf32>
    %c240_i32 = arith.constant 240 : i32
    %124 = tpu.dynamic_rotate %0 by %c240_i32 dim 2 : vector<1x4x256xf32>, i32 -> vector<1x4x256xf32>
    %c7 = arith.constant 7 : index
    %c0_42 = arith.constant 0 : index
    %c0_43 = arith.constant 0 : index
    %125 = vector.load %arg2[%c7, %c0_42, %c0_43] : memref<27x1x256xf32, #tpu.memory_space<vmem>>, vector<1x1x256xf32>
    %126 = vector.shape_cast %125 : vector<1x1x256xf32> to vector<1x256xf32>
    %127 = vector.shape_cast %126 : vector<1x256xf32> to vector<1x1x256xf32>
    %128 = vector.broadcast %127 : vector<1x1x256xf32> to vector<1x4x256xf32>
    %129 = arith.mulf %124, %128 : vector<1x4x256xf32>
    %130 = arith.addf %111, %129 : vector<1x4x256xf32>
    %c16 = arith.constant 16 : index
    %c0_44 = arith.constant 0 : index
    %c0_45 = arith.constant 0 : index
    %131 = vector.load %arg2[%c16, %c0_44, %c0_45] : memref<27x1x256xf32, #tpu.memory_space<vmem>>, vector<1x1x256xf32>
    %132 = vector.shape_cast %131 : vector<1x1x256xf32> to vector<1x256xf32>
    %133 = vector.shape_cast %132 : vector<1x256xf32> to vector<1x1x256xf32>
    %134 = vector.broadcast %133 : vector<1x1x256xf32> to vector<1x4x256xf32>
    %135 = arith.mulf %124, %134 : vector<1x4x256xf32>
    %136 = arith.addf %117, %135 : vector<1x4x256xf32>
    %c25 = arith.constant 25 : index
    %c0_46 = arith.constant 0 : index
    %c0_47 = arith.constant 0 : index
    %137 = vector.load %arg2[%c25, %c0_46, %c0_47] : memref<27x1x256xf32, #tpu.memory_space<vmem>>, vector<1x1x256xf32>
    %138 = vector.shape_cast %137 : vector<1x1x256xf32> to vector<1x256xf32>
    %139 = vector.shape_cast %138 : vector<1x256xf32> to vector<1x1x256xf32>
    %140 = vector.broadcast %139 : vector<1x1x256xf32> to vector<1x4x256xf32>
    %141 = arith.mulf %124, %140 : vector<1x4x256xf32>
    %142 = arith.addf %123, %141 : vector<1x4x256xf32>
    %c239_i32 = arith.constant 239 : i32
    %143 = tpu.dynamic_rotate %0 by %c239_i32 dim 2 : vector<1x4x256xf32>, i32 -> vector<1x4x256xf32>
    %c8 = arith.constant 8 : index
    %c0_48 = arith.constant 0 : index
    %c0_49 = arith.constant 0 : index
    %144 = vector.load %arg2[%c8, %c0_48, %c0_49] : memref<27x1x256xf32, #tpu.memory_space<vmem>>, vector<1x1x256xf32>
    %145 = vector.shape_cast %144 : vector<1x1x256xf32> to vector<1x256xf32>
    %146 = vector.shape_cast %145 : vector<1x256xf32> to vector<1x1x256xf32>
    %147 = vector.broadcast %146 : vector<1x1x256xf32> to vector<1x4x256xf32>
    %148 = arith.mulf %143, %147 : vector<1x4x256xf32>
    %149 = arith.addf %130, %148 : vector<1x4x256xf32>
    %c17 = arith.constant 17 : index
    %c0_50 = arith.constant 0 : index
    %c0_51 = arith.constant 0 : index
    %150 = vector.load %arg2[%c17, %c0_50, %c0_51] : memref<27x1x256xf32, #tpu.memory_space<vmem>>, vector<1x1x256xf32>
    %151 = vector.shape_cast %150 : vector<1x1x256xf32> to vector<1x256xf32>
    %152 = vector.shape_cast %151 : vector<1x256xf32> to vector<1x1x256xf32>
    %153 = vector.broadcast %152 : vector<1x1x256xf32> to vector<1x4x256xf32>
    %154 = arith.mulf %143, %153 : vector<1x4x256xf32>
    %155 = arith.addf %136, %154 : vector<1x4x256xf32>
    %c26 = arith.constant 26 : index
    %c0_52 = arith.constant 0 : index
    %c0_53 = arith.constant 0 : index
    %156 = vector.load %arg2[%c26, %c0_52, %c0_53] : memref<27x1x256xf32, #tpu.memory_space<vmem>>, vector<1x1x256xf32>
    %157 = vector.shape_cast %156 : vector<1x1x256xf32> to vector<1x256xf32>
    %158 = vector.shape_cast %157 : vector<1x256xf32> to vector<1x1x256xf32>
    %159 = vector.broadcast %158 : vector<1x1x256xf32> to vector<1x4x256xf32>
    %160 = arith.mulf %143, %159 : vector<1x4x256xf32>
    %161 = arith.addf %142, %160 : vector<1x4x256xf32>
    %c3_54 = arith.constant 3 : index
    %162 = memref.load %arg1[%c3_54] : memref<5xf32, #tpu.memory_space<smem>>
    %163 = vector.broadcast %162 : f32 to vector<1x4x256xf32>
    %164 = arith.addf %155, %163 : vector<1x4x256xf32>
    %cst = arith.constant 0.000000e+00 : f32
    %165 = vector.broadcast %cst : f32 to vector<1x1x256xf32>
    %166 = vector.extract_strided_slice %149 {offsets = [0, 0, 0], sizes = [1, 3, 256], strides = [1, 1, 1]} : vector<1x4x256xf32> to vector<1x3x256xf32>
    %167 = tpu.concatenate %165, %166 in 1 : vector<1x1x256xf32>, vector<1x3x256xf32> -> vector<1x4x256xf32>
    %168 = arith.addf %164, %167 : vector<1x4x256xf32>
    %169 = vector.extract_strided_slice %161 {offsets = [0, 1, 0], sizes = [1, 3, 256], strides = [1, 1, 1]} : vector<1x4x256xf32> to vector<1x3x256xf32>
    %170 = tpu.concatenate %169, %165 in 1 : vector<1x3x256xf32>, vector<1x1x256xf32> -> vector<1x4x256xf32>
    %171 = arith.addf %168, %170 : vector<1x4x256xf32>
    %c4 = arith.constant 4 : index
    %172 = memref.load %arg1[%c4] : memref<5xf32, #tpu.memory_space<smem>>
    %173 = arith.negf %171 : vector<1x4x256xf32>
    %174 = math.exp %173 : vector<1x4x256xf32>
    %cst_55 = arith.constant 1.000000e+00 : f32
    %175 = vector.broadcast %cst_55 : f32 to vector<1x4x256xf32>
    %176 = arith.addf %175, %174 : vector<1x4x256xf32>
    %177 = arith.divf %175, %176 : vector<1x4x256xf32>
    %178 = vector.broadcast %172 : f32 to vector<1x4x256xf32>
    %179 = arith.mulf %178, %177 : vector<1x4x256xf32>
    %180 = arith.mulf %0, %179 : vector<1x4x256xf32>
    %181 = arith.addf %180, %0 : vector<1x4x256xf32>
    %c0_56 = arith.constant 0 : index
    %c0_57 = arith.constant 0 : index
    %c0_58 = arith.constant 0 : index
    %182 = vector.load %arg4[%c0_56, %c0_57, %c0_58] : memref<1x4x256xf32, #tpu.memory_space<vmem>>, vector<1x4x256xf32>
    tpu.vector_store %arg4[%c0_56, %c0_57, %c0_58], %181 {strides = array<i32>} : memref<1x4x256xf32, #tpu.memory_space<vmem>>, vector<1x4x256xf32>,
    return
  }
  func.func @transform_0(%arg0: i32) -> i32 {
    %c0_i32 = arith.constant 0 : i32
    %c0_i32_0 = arith.constant 0 : i32
    return %c0_i32 : i32
  }
  func.func @transform_1(%arg0: i32) -> (i32, i32, i32) {
    %c0_i32 = arith.constant 0 : i32
    %c0_i32_0 = arith.constant 0 : i32
    %c0_i32_1 = arith.constant 0 : i32
    %c0_i32_2 = arith.constant 0 : i32
    return %c0_i32, %c0_i32_0, %c0_i32_1 : i32, i32, i32
  }
  func.func @transform_2(%arg0: i32) -> (i32, i32, i32) {
    %c0_i32 = arith.constant 0 : i32
    %c0_i32_0 = arith.constant 0 : i32
    %c0_i32_1 = arith.constant 0 : i32
    return %arg0, %c0_i32, %c0_i32_0 : i32, i32, i32
  }
  func.func @transform_3(%arg0: i32) -> (i32, i32, i32) {
    %c0_i32 = arith.constant 0 : i32
    %c0_i32_0 = arith.constant 0 : i32
    %c0_i32_1 = arith.constant 0 : i32
    return %arg0, %c0_i32, %c0_i32_0 : i32, i32, i32
  }
}

</mosaic_0001>

<bundles_post_ra>
// kernel: csam_forward.1
= control target key start
LH: loop header
LB: loop body
LE: loop exit
PB: predicated region body
PF: predicated region fallthrough
CT: control target
= control target key end

     0   :  { %8 = vsyncpa [#allocation3], 0  ;;  %s976_s12 = smov 0   ;;  %s1445_s0 = inlined_call_operand.vmem [shape: f32[5], index: 0, kind: input, shape index: {}]   ;;  %s1446_s1 = inlined_call_operand.vmem [shape: f32[27,1,256], index: 1, kind: input, shape index: {}]   ;;  %s1447_s2 = inlined_call_operand.vmem [shape: f32[2,4,256], index: 2, kind: input, shape index: {}]   ;;  %s1448_s3 = inlined_call_operand.vmem [shape: f32[2,4,256], index: 3, kind: output, shape index: {}]  }
   0x1 LB: > { %s845_s13 = sadd.s32 4294967295, %s945_s12   ;;  %p847_p0 = scmp.ge.s32.totalorder %s945_s12, 1  ;;  %s945_s12 = sphi %s976_s12, %s14_s12  }
   0x2   : > { %p113_p1 = scmp.lt.s32.totalorder %s945_s12, 3  ;;  %s126_s16 = sshll.u32 %s1445_s0, 4  ;;  %s127_s16 = int_to_ptr.vmem [resolvable:$true] %s126_s16 }
   0x3   : > { %p896_p3 = scmp.eq.s32.totalorder %s845_s13, 0  ;;  %s920_s18 = scalar_lea.vmem %s127_s16, 16 }
   0x4   : > { %p987_p2 = pnand %p847_p0, %p113_p1  ;;  %p921_p6 = scmp.ne.s32.totalorder %s127_s16, %s920_s18 }
   0x5   : > { %p928_p10 = scmp.lt.s32.totalorder %s127_s16, %s127_s16  ;;  %p929_p11 = scmp.lt.s32.totalorder %s920_s18, %s920_s18 }
   0x6   : > { %p892_p4 = pneg %p987_p2 }
   0x7   : > { %p930_p12 = por %p929_p11, %p928_p10 }
   0x8   : > { %p893_p5 = pnand %p896_p3, %p892_p4 }
   0xa   : > { %p922_p7 = pneg %p893_p5 }
   0xc   : > { %p923_p8 = pnand %p922_p7, %p921_p6 }
   0xe   : > { %p924_p9 = pneg %p923_p8 }
  0x10   : > { %p931_p13 = pnand %p930_p12, %p924_p9 }
  0x12   : > { %934 = shalt.err (!%p931_p13)
}
  0x13   : > { %s947_s19 = smov [#allocation2]   ;;  %150 = sbr.rel (%p987_p2) target bundleno = 234 (0xea), region = 32 }
  0x14   : > { %895 = dma.vmem_to_smem (!%p893_p5), %s127_s16, 16, %s947_s19, [#allocation3]  }
  0x1a   : > { %940 = dma.done.wait (%p896_p3), [#allocation3], 16  }
  0x1b   : > { %942 = vsyncadd (%p896_p3), [#allocation3], 4294967280 }
  0x1c   : > { %156 = sfence }
  0x1d   : > { %p175_p0 = scmp.lt.s32.totalorder %s845_s13, 1  ;;  %s948_s24 = smov 16   ;;  %v202_v2 = vlaneseq  ;;  %v1033_v7 = vld [vmem:[%s1446_s1 + $0x2] sm:$0x3]  ;;  %v1038_v8 = vld [vmem:[%s1446_s1 + $0x14] sm:$0x3] }
  0x1e   : > { %s949_s25 = smov 17   ;;  %s950_s26 = smov 15   ;;  %v1043_v9 = vld [vmem:[%s1446_s1 + $0x26] sm:$0x3]  ;;  %v1048_v10 = vld [vmem:[%s1446_s1 + $0x4] sm:$0x3] }
  0x1f   : > { %s1471_s13 = smov (!%p175_p0, %s845_s13), 1  ;;  %s951_s27 = smov 1   ;;  %v210_v3 = vshrl.u32 %v202_v2, 7  ;;  %v1018_v4 = vand.u32 127, %v202_v2  ;;  %v1053_v11 = vld [vmem:[%s1446_s1 + $0x16] sm:$0x3] }
  0x20   : > { %s886_s20 = sshll.u32 %s1471_s13, 3  ;;  %s952_s28 = smov 127   ;;  %v1058_v12 = vld [vmem:[%s1446_s1 + $0x28] sm:$0x3]  ;;  %v1072_v17 = vld [vmem:[%s1446_s1] sm:$0x3] }
  0x21   : > { %s179_s23 = scalar_lea.vmem %s1447_s2, %s886_s20  ;;  %s953_s29 = smov 113   ;;  %v1022_v5 = vsub.s32 0, %v210_v3  ;;  %v1024_v6 = vsub.s32 1, %v210_v3  ;;  %vm270_vm0 = vcmp.lt.s32.totalorder %v1018_v4, 16  ;;  %v1077_v18 = vld [vmem:[%s1446_s1 + $0x12] sm:$0x3] }
  0x22   : > { %v1006_v0 = vld [vmem:[%s179_s23] sm:$0xff]  ;;  %s954_s30 = smov 112   ;;  %s955_s4 = smov 111   ;;  %v1108_v29 = vld [vmem:[%s1446_s1 + $0x18] sm:$0x3]  ;;  %vm337_vm1 = vcmp.lt.s32.totalorder %v1018_v4, 15 }
  0x23   : > { %266 = vrot.lane.b32.xlu1 %v1006_v0, %s948_s24  ;;  %198 = vrot.lane.b32.xlu0 %v1006_v0, %s949_s25  ;;  %v196_v1 = vcombine.high %v1006_v0, %v1006_v0  ;;  %s1020_s5 = sld [smem:[#allocation2]]  ;;  %s1026_s6 = sld [smem:[#allocation2 + $0x1]]  ;;  %v279_v13 = vrot.slane %v1033_v7, %v1022_v5  ;;  %v283_v14 = vrot.slane %v1033_v7, %v1024_v6  ;;  %v1090_v23 = vld [vmem:[%s1446_s1 + $0x24] sm:$0x3]  ;;  %v1103_v28 = vld [vmem:[%s1446_s1 + $0x6] sm:$0x3] }
  0x24   : > { %s1028_s7 = sld [smem:[#allocation2 + $0x2]]  ;;  %v299_v15 = vrot.slane %v1038_v8, %v1022_v5  ;;  %v303_v16 = vrot.slane %v1038_v8, %v1024_v6  ;;  %v319_v19 = vrot.slane %v1043_v9, %v1022_v5  ;;  %v323_v20 = vrot.slane %v1043_v9, %v1024_v6  ;;  %v1120_v34 = vld [vmem:[%s1446_s1 + $0x2a] sm:$0x3]  ;;  %v1146_v44 = vld [vmem:[%s1446_s1 + $0x1c] sm:$0x3]  ;;  %s882_s11 = sld [smem:[#allocation2 + $0x4]] }
  0x25   : > { %v346_v21 = vrot.slane %v1048_v10, %v1022_v5  ;;  %v350_v22 = vrot.slane %v1048_v10, %v1024_v6  ;;  %v366_v24 = vrot.slane %v1053_v11, %v1022_v5  ;;  %v370_v25 = vrot.slane %v1053_v11, %v1024_v6  ;;  %v1133_v39 = vld [vmem:[%s1446_s1 + $0xa] sm:$0x3]  ;;  %v1151_v45 = vld [vmem:[%s1446_s1 + $0x2e] sm:$0x3]  ;;  %v1165_v52 = vld [vmem:[%s1446_s1 + $0xc] sm:$0x3]  ;;  %s184_s14 = scalar_lea.vmem %s1448_s3, %s886_s20 }
  0x26   : > { %v386_v26 = vrot.slane %v1058_v12, %v1022_v5  ;;  %v390_v27 = vrot.slane %v1058_v12, %v1024_v6  ;;  %v212_v31 = vrot.slane %v1072_v17, %v1022_v5  ;;  %v216_v32 = vrot.slane %v1072_v17, %v1024_v6  ;;  %v1170_v53 = vld [vmem:[%s1446_s1 + $0x1e] sm:$0x3]  ;;  %v1185_v58 = vld [vmem:[%s1446_s1 + $0x30] sm:$0x3]  ;;  %v1190_v59 = vld [vmem:[%s1446_s1 + $0xe] sm:$0x3] }
  0x27   : > { %333 = vrot.lane.b32.xlu0 %v1006_v0, %s950_s26  ;;  %268 = vrot.lane.b32.xlu1 %v196_v1, %s948_s24  ;;  %v232_v33 = vrot.slane %v1077_v18, %v1022_v5  ;;  %vm204_vm2 = vcmp.lt.s32.totalorder %v1018_v4, 17  ;;  %v236_v37 = vrot.slane %v1077_v18, %v1024_v6  ;;  %v252_v38 = vrot.slane %v1090_v23, %v1022_v5  ;;  %v1238_v2 = vld [vmem:[%s1446_s1 + $0x10] sm:$0x3] }
  0x28   : > { %v256_v40 = vrot.slane %v1090_v23, %v1024_v6  ;;  %v413_v41 = vrot.slane %v1103_v28, %v1022_v5  ;;  %v417_v42 = vrot.slane %v1103_v28, %v1024_v6  ;;  %v433_v43 = vrot.slane %v1108_v29, %v1022_v5 }
  0x29   : > { %v187_v30 = vstv %s1020_s5  ;;  %v190_v35 = vstv %s1026_s6  ;;  %v437_v49 = vrot.slane %v1108_v29, %v1024_v6  ;;  %v453_v50 = vrot.slane %v1120_v34, %v1022_v5  ;;  %s881_s5 = sld [smem:[#allocation2 + $0x3]] }
  0x2a   : > { %v193_v36 = vstv %s1028_s7  ;;  %v1154_v48 = vmul.f32 %v187_v30, %v1006_v0  ;;  %v457_v51 = vrot.slane %v1120_v34, %v1024_v6  ;;  %v1173_v54 = vmul.f32 %v190_v35, %v1006_v0  ;;  %v1243_v30 = vld [vmem:[%s1446_s1 + $0x22] sm:$0x3]  ;;  %v880_v34 = vld [vmem:[%s1446_s1 + $0x34] sm:$0x3] }
  0x2b   : > { %335 = vrot.lane.b32.xlu1 %v196_v1, %s950_s26  ;;  %200 = vrot.lane.b32.xlu0 %v196_v1, %s949_s25  ;;  %v1176_v55 = vmul.f32 %v193_v36, %v1006_v0  ;;  %vm404_vm3 = vcmp.lt.s32.totalorder %v1018_v4, 1  ;;  %v1217_v36 = vld [vmem:[%s1446_s1 + $0x32] sm:$0x3]  ;;  %vm471_vm4 = vcmp.lt.s32.totalorder %v1018_v4, 127  ;;  %v681_v61 = vrot.slane %v1238_v2, %v1022_v5 }
  0x2c   : > { %vm538_vm5 = vcmp.lt.s32.totalorder %v1018_v4, 113  ;;  %vm605_vm6 = vcmp.lt.s32.totalorder %v1018_v4, 112  ;;  %vm672_vm7 = vcmp.lt.s32.totalorder %v1018_v4, 111  ;;  %v1469_v4 = vrot.slane %v1243_v30, %v1024_v6 }
  0x2d   : > { %vm744_vm8 = vcmask 1040384   ;;  %vm758_vm9 = vcmask 1042432  }
  0x2f   : > { %402 = vrot.lane.b32.xlu1 %v196_v1, %s951_s27  ;;  %400 = vrot.lane.b32.xlu0 %v1006_v0, %s951_s27 }
  0x33   : > { %469 = vrot.lane.b32.xlu1 %v196_v1, %s952_s28  ;;  %467 = vrot.lane.b32.xlu0 %v1006_v0, %s952_s28 }
  0x37   : > { %536 = vrot.lane.b32.xlu1 %v196_v1, %s953_s29  ;;  %534 = vrot.lane.b32.xlu0 %v1006_v0, %s953_s29 }
  0x3b   : > { %603 = vrot.lane.b32.xlu1 %v196_v1, %s954_s30  ;;  %601 = vrot.lane.b32.xlu0 %v1006_v0, %s954_s30 }
  0x3f   : > { %670 = vrot.lane.b32.xlu1 %v196_v1, %s955_s4  ;;  %668 = vrot.lane.b32.xlu0 %v1006_v0, %s955_s4  ;;  %v1203_v1 = vld [vmem:[%s1446_s1 + $0x20] sm:$0x3] }
  0x95   : > { %v267_v46 = vpop.permute.xlu1 %266  ;;  %v199_v47 = vpop.permute.xlu0 %198 }
  0x99   : > { %v334_v63 = vpop.permute.xlu0 %333  ;;  %v269_v62 = vpop.permute.xlu1 %268 }
  0x9a   : > { %v271_v35 = vsel %vm270_vm0, %v267_v46, %v269_v62  ;;  %v272_v60 = vsel %vm270_vm0, %v269_v62, %v267_v46 }
  0x9b   : > { %v286_v46 = vmul.f32 %v279_v13, %v272_v60  ;;  %v287_v62 = vmul.f32 %v283_v14, %v271_v35  ;;  %v306_v3 = vmul.f32 %v299_v15, %v272_v60  ;;  %v307_v56 = vmul.f32 %v303_v16, %v271_v35 }
  0x9c   : > { %v326_v13 = vmul.f32 %v319_v19, %v272_v60  ;;  %v327_v7 = vmul.f32 %v323_v20, %v271_v35  ;;  %v685_v15 = vrot.slane %v1238_v2, %v1024_v6 }
  0x9d   : > { %v336_v14 = vpop.permute.xlu1 %335  ;;  %v201_v57 = vpop.permute.xlu0 %200  ;;  %v290_v19 = vcombine.low %v286_v46, %v287_v62 }
  0x9e   : > { %v338_v9 = vsel %vm337_vm1, %v334_v63, %v336_v14  ;;  %v339_v20 = vsel %vm337_vm1, %v336_v14, %v334_v63  ;;  %v205_v60 = vsel %vm204_vm2, %v199_v47, %v201_v57  ;;  %v310_v63 = vcombine.low %v306_v3, %v307_v56 }
  0x9f   : > { %v353_v35 = vmul.f32 %v346_v21, %v339_v20  ;;  %v354_v8 = vmul.f32 %v350_v22, %v338_v9  ;;  %v373_v46 = vmul.f32 %v366_v24, %v339_v20  ;;  %v374_v62 = vmul.f32 %v370_v25, %v338_v9 }
  0xa0   : > { %v330_v14 = vcombine.low %v326_v13, %v327_v7  ;;  %v206_v16 = vsel %vm204_vm2, %v201_v57, %v199_v47  ;;  %v220_v21 = vmul.f32 %v216_v32, %v205_v60  ;;  %v393_v10 = vmul.f32 %v386_v26, %v339_v20 }
  0xa1   : > { %v394_v11 = vmul.f32 %v390_v27, %v338_v9  ;;  %v219_v22 = vmul.f32 %v212_v31, %v206_v16  ;;  %v239_v24 = vmul.f32 %v232_v33, %v206_v16  ;;  %v403_v25 = vpop.permute.xlu1 %402  ;;  %v401_v32 = vpop.permute.xlu0 %400  ;;  %v357_v47 = vcombine.low %v353_v35, %v354_v8 }
  0xa2   : > { %v240_v56 = vmul.f32 %v236_v37, %v205_v60  ;;  %v259_v12 = vmul.f32 %v252_v38, %v206_v16  ;;  %v260_v17 = vmul.f32 %v256_v40, %v205_v60  ;;  %v377_v26 = vcombine.low %v373_v46, %v374_v62 }
  0xa3   : > { %v223_v27 = vcombine.low %v219_v22, %v220_v21  ;;  %v405_v31 = vsel %vm404_vm3, %v401_v32, %v403_v25  ;;  %v406_v33 = vsel %vm404_vm3, %v403_v25, %v401_v32  ;;  %v397_v23 = vcombine.low %v393_v10, %v394_v11 }
  0xa4   : > { %v243_v57 = vcombine.low %v239_v24, %v240_v56  ;;  %v263_v3 = vcombine.low %v259_v12, %v260_v17  ;;  %v420_v18 = vmul.f32 %v413_v41, %v406_v33  ;;  %v421_v37 = vmul.f32 %v417_v42, %v405_v31 }
  0xa5   : > { %v225_v38 = vadd.f32 %v223_v27, %v1154_v48  ;;  %v440_v40 = vmul.f32 %v433_v43, %v406_v33  ;;  %v441_v13 = vmul.f32 %v437_v49, %v405_v31  ;;  %v470_v7 = vpop.permute.xlu1 %469  ;;  %v468_v8 = vpop.permute.xlu0 %467  ;;  %v460_v16 = vmul.f32 %v453_v50, %v406_v33 }
  0xa6   : > { %v245_v41 = vadd.f32 %v243_v57, %v1173_v54  ;;  %v265_v28 = vadd.f32 %v263_v3, %v1176_v55  ;;  %v424_v42 = vcombine.low %v420_v18, %v421_v37  ;;  %v461_v43 = vmul.f32 %v457_v51, %v405_v31 }
  0xa7   : > { %v292_v48 = vadd.f32 %v290_v19, %v225_v38  ;;  %v472_v29 = vsel %vm471_vm4, %v468_v8, %v470_v7  ;;  %v473_v49 = vsel %vm471_vm4, %v470_v7, %v468_v8  ;;  %v444_v9 = vcombine.low %v440_v40, %v441_v13 }
  0xa8   : > { %v312_v54 = vadd.f32 %v310_v63, %v245_v41  ;;  %v332_v55 = vadd.f32 %v330_v14, %v265_v28  ;;  %v1450_v20 = vrot.slane %v1133_v39, %v1022_v5  ;;  %v1451_v19 = vrot.slane %v1133_v39, %v1024_v6 }
  0xa9   : > { %v359_v51 = vadd.f32 %v357_v47, %v292_v48  ;;  %v1452_v35 = vrot.slane %v1146_v44, %v1022_v5  ;;  %v1453_v62 = vrot.slane %v1146_v44, %v1024_v6  ;;  %v537_v14 = vpop.permute.xlu1 %536  ;;  %v535_v21 = vpop.permute.xlu0 %534  ;;  %v1454_v22 = vrot.slane %v1151_v45, %v1022_v5 }
  0xaa   : > { %v487_v50 = vmul.f32 %v1450_v20, %v472_v29  ;;  %v488_v60 = vmul.f32 %v1451_v19, %v473_v49  ;;  %v379_v10 = vadd.f32 %v377_v26, %v312_v54  ;;  %v399_v11 = vadd.f32 %v397_v23, %v332_v55 }
  0xab   : > { %v507_v46 = vmul.f32 %v1452_v35, %v472_v29  ;;  %v508_v63 = vmul.f32 %v1453_v62, %v473_v49  ;;  %v527_v24 = vmul.f32 %v1454_v22, %v472_v29  ;;  %v1455_v39 = vrot.slane %v1151_v45, %v1024_v6 }
  0xac   : > { %v426_v32 = vadd.f32 %v424_v42, %v359_v51  ;;  %v464_v47 = vcombine.low %v460_v16, %v461_v43  ;;  %v539_v56 = vsel %vm538_vm5, %v535_v21, %v537_v14  ;;  %v721_v44 = vrot.slane %v880_v34, %v1022_v5 }
  0xad   : > { %v528_v25 = vmul.f32 %v1455_v39, %v473_v49  ;;  %v446_v12 = vadd.f32 %v444_v9, %v379_v10  ;;  %v491_v17 = vcombine.low %v487_v50, %v488_v60  ;;  %v511_v27 = vcombine.low %v507_v46, %v508_v63  ;;  %v604_v18 = vpop.permute.xlu1 %603  ;;  %v602_v37 = vpop.permute.xlu0 %601 }
  0xae   : > { %v540_v26 = vsel %vm538_vm5, %v537_v14, %v535_v21  ;;  %v466_v31 = vadd.f32 %v464_v47, %v399_v11  ;;  %v1456_v33 = vrot.slane %v1165_v52, %v1022_v5  ;;  %v1457_v45 = vrot.slane %v1165_v52, %v1024_v6 }
  0xaf   : > { %v725_v23 = vrot.slane %v880_v34, %v1024_v6  ;;  %v531_v38 = vcombine.low %v527_v24, %v528_v25  ;;  %v1458_v40 = vrot.slane %v1170_v53, %v1022_v5  ;;  %v1459_v7 = vrot.slane %v1170_v53, %v1024_v6 }
  0xb0   : > { %v554_v57 = vmul.f32 %v1456_v33, %v539_v56  ;;  %v555_v3 = vmul.f32 %v1457_v45, %v540_v26  ;;  %v1460_v41 = vrot.slane %v1185_v58, %v1022_v5  ;;  %v1461_v52 = vrot.slane %v1185_v58, %v1024_v6 }
  0xb1   : > { %v574_v13 = vmul.f32 %v1458_v40, %v539_v56  ;;  %v575_v8 = vmul.f32 %v1459_v7, %v540_v26  ;;  %v606_v48 = vsel %vm605_vm6, %v602_v37, %v604_v18  ;;  %v607_v43 = vsel %vm605_vm6, %v604_v18, %v602_v37  ;;  %v671_v35 = vpop.permute.xlu1 %670  ;;  %v669_v46 = vpop.permute.xlu0 %668 }
  0xb2   : > { %v594_v28 = vmul.f32 %v1460_v41, %v539_v56  ;;  %v558_v42 = vcombine.low %v554_v57, %v555_v3  ;;  %v595_v16 = vmul.f32 %v1461_v52, %v540_v26  ;;  %v493_v29 = vadd.f32 %v491_v17, %v426_v32 }
  0xb3   : > { %v513_v49 = vadd.f32 %v511_v27, %v446_v12  ;;  %v1462_v53 = vrot.slane %v1190_v59, %v1022_v5  ;;  %v1463_v55 = vrot.slane %v1190_v59, %v1024_v6  ;;  %v1464_v58 = vrot.slane %v1203_v1, %v1022_v5 }
  0xb4   : > { %v598_v20 = vcombine.low %v594_v28, %v595_v16  ;;  %v1465_v34 = vrot.slane %v1203_v1, %v1024_v6  ;;  %v1466_v19 = vrot.slane %v1217_v36, %v1022_v5  ;;  %v533_v62 = vadd.f32 %v531_v38, %v466_v31 }
  0xb5   : > { %v621_v54 = vmul.f32 %v1462_v53, %v606_v48  ;;  %v622_v9 = vmul.f32 %v1463_v55, %v607_v43  ;;  %v641_v50 = vmul.f32 %v1464_v58, %v606_v48  ;;  %v1467_v59 = vrot.slane %v1217_v36, %v1024_v6 }
  0xb6   : > { %v642_v51 = vmul.f32 %v1465_v34, %v607_v43  ;;  %v661_v60 = vmul.f32 %v1466_v19, %v606_v48  ;;  %v673_v21 = vsel %vm672_vm7, %v669_v46, %v671_v35  ;;  %v560_v10 = vadd.f32 %v558_v42, %v493_v29 }
  0xb7   : > { %v625_v63 = vcombine.low %v621_v54, %v622_v9  ;;  %v662_v14 = vmul.f32 %v1467_v59, %v607_v43  ;;  %v578_v11 = vcombine.low %v574_v13, %v575_v8  ;;  %v674_v1 = vsel %vm672_vm7, %v671_v35, %v669_v46 }
  0xb8   : > { %v688_v22 = vmul.f32 %v681_v61, %v673_v21  ;;  %v600_v24 = vadd.f32 %v598_v20, %v533_v62  ;;  %v689_v36 = vmul.f32 %v685_v15, %v674_v1  ;;  %v1468_v25 = vrot.slane %v1243_v30, %v1022_v5 }
  0xb9   : > { %v665_v39 = vcombine.low %v661_v60, %v662_v14  ;;  %v645_v47 = vcombine.low %v641_v50, %v642_v51  ;;  %v709_v56 = vmul.f32 %v1469_v4, %v674_v1  ;;  %v728_v12 = vmul.f32 %v721_v44, %v673_v21 }
  0xba   : > { %v708_v32 = vmul.f32 %v1468_v25, %v673_v21  ;;  %v729_v17 = vmul.f32 %v725_v23, %v674_v1  ;;  %v627_v27 = vadd.f32 %v625_v63, %v560_v10  ;;  %v692_v61 = vcombine.low %v688_v22, %v689_v36 }
  0xbb   : > { %v580_v26 = vadd.f32 %v578_v11, %v513_v49  ;;  %v667_v31 = vadd.f32 %v665_v39, %v600_v24  ;;  %v736_v38 = vstv %s881_s5  ;;  %v773_v29 = vstv %s882_s11 }
  0xbc   : > { %v712_v33 = vcombine.low %v708_v32, %v709_v56  ;;  %v732_v57 = vcombine.low %v728_v12, %v729_v17  ;;  %v694_v45 = vadd.f32 %v692_v61, %v627_v27 }
  0xbd   : > { %v647_v2 = vadd.f32 %v645_v47, %v580_v26 }
  0xbe   : > { %v734_v15 = vadd.f32 %v732_v57, %v667_v31  ;;  %v739_v3 = vcombine.high %v694_v45, %v694_v45  ;;  %v740_v18 = vrot.slane %v694_v45, 7 }
  0xbf   : > { %v714_v5 = vadd.f32 %v712_v33, %v647_v2 }
  0xc0   : > { %v753_v37 = vcombine.high %v734_v15, %v734_v15  ;;  %v741_v40 = vrot.slane %v739_v3, 7  ;;  %v754_v6 = vrot.slane %v734_v15, 1  ;;  %v745_v44 = vsel %vm744_vm8, 0.0, %v740_v18 }
  0xc1   : > { %v737_v13 = vadd.f32 %v736_v38, %v714_v5 }
  0xc2   : > { %v755_v30 = vrot.slane %v753_v37, 1  ;;  %v746_v23 = vsel %vm744_vm8, 0.0, %v741_v40  ;;  %v759_v41 = vsel %vm758_vm9, %v754_v6, 0.0 }
  0xc3   : > { %v749_v7 = vcombine.low %v745_v44, %v746_v23 }
  0xc4   : > { %v760_v8 = vsel %vm758_vm9, %v755_v30, 0.0 }
  0xc5   : > { %v751_v28 = vadd.f32 %v749_v7, %v737_v13  ;;  %v763_v42 = vcombine.low %v759_v41, %v760_v8 }
  0xc7   : > { %v765_v52 = vadd.f32 %v763_v42, %v751_v28 }
  0xc9   : > { %v883_v16 = vmul.f32 -1.442695, %v765_v52 }
  0xcb   : > { %916 = vpow2.f32 %v883_v16 }
  0xd5   : > { %v917_v48 = vpop.eup %916 }
  0xd6   : > { %v770_v43 = vadd.f32 1.0, %v917_v48 }
  0xd8   : > { %918 = vrcp.f32 %v770_v43 }
  0xe2   : > { %v919_v49 = vpop.eup %918 }
  0xe3   : > { %v774_v53 = vmul.f32 %v919_v49, %v773_v29 }
  0xe5   : > { %v775_v54 = vmul.f32 %v774_v53, %v1006_v0 }
  0xe7   : > { %v776_v55 = vadd.f32 %v775_v54, %v1006_v0 }
  0xe9   : > { %777 = vst [vmem:[%s184_s14] sm:$0xff] %v776_v55 }
  0xea PF: > { %s14_s12 = sadd.s32 1, %s945_s12  }
  0xeb   : > { %p11_p1 = scmp.ge.s32.totalorder %s14_s12, 4  }
  0xed   :  { %13 = sbr.rel (!%p11_p1) target bundleno = 1 (0x1), region = 90 }
  0xf4   :  { %799 = vsyncpa [#allocation3], 1 }
  0xf5   :  { %801 = vsyncpa [#allocation3 + $0x1], 1 }

</bundles_post_ra>
